<compile_context>
chip_gen: v5e
topology: v5e:2x2
jax: 0.10.0
libtpu: 0.0.40
codegen_flags: <defaults>
</compile_context>

<pallas_src>
import functools

import jax
import jax.numpy as jnp
from jax.experimental import pallas as pl
from jax.experimental.pallas import tpu as pltpu

# Lanes per block (multiple of 128). Keep >= 512 in production so each per-(row, channel)
# HBM segment is >= 2 KB (f32); the 128-lane path below is for correctness tests only.
_LANE_TILE_TARGET = 2048


@functools.lru_cache(maxsize=None)
def _chip_budget():
    """(block element-count target, scoped-VMEM limit bytes), sized per TPU generation."""
    try:
        vmem_bytes = pltpu.get_tpu_info().vmem_capacity_bytes
    except Exception:  # unknown chip / interpret mode: assume the smallest VMEM (v7x, 64 MiB)
        vmem_bytes = 64 * 1024 * 1024
    if vmem_bytes >= 100 * 1024 * 1024:            # v5e / v6e: 128 MiB VMEM
        return 2 * 1024 * 1024, 96 * 1024 * 1024   # ~8 MiB f32 blocks, 96 MiB scoped VMEM
    return 1 * 1024 * 1024, 48 * 1024 * 1024       # v7x: ~4 MiB f32 blocks, 48 MiB scoped VMEM


def _largest_divisor_leq(n, limit, multiple_of=1):
    for d in range(min(n, limit), 0, -1):
        if n % d == 0 and d % multiple_of == 0:
            return d
    return n


def _pick_tiles(nt, c, hw, elems_target, block_rows=None, block_lanes=None):
    if block_lanes is None:
        if hw % 128 == 0:
            block_lanes = _largest_divisor_leq(hw, _LANE_TILE_TARGET, multiple_of=128)
        else:
            # Fallback: full lane extent (always a legal block dim). NOTE: a non-128-multiple
            # HW (e.g. 14x14, 7x7) means masked vst stores / short DMA segments in pass 2;
            # pad HW upstream if this shows up on a hot path.
            block_lanes = hw
    if block_rows is None:
        # Size by element count (not bytes) so bf16 inputs don't double the f32 working set.
        limit = max(1, elems_target // (c * block_lanes))
        block_rows = _largest_divisor_leq(nt, limit)
    assert nt % block_rows == 0 and hw % block_lanes == 0
    return block_rows, block_lanes


def _stats_kernel(x_ref, sum_ref, sq_ref):
    # x_ref: (bt, C, bm) block.
    # sum_ref / sq_ref: (1, C, acc_w) f32 partial sums for the current row block, resident
    # across the lane grid axis (axis 1 of the grid).
    @pl.when(pl.program_id(1) == 0)
    def _init():
        sum_ref[...] = jnp.zeros_like(sum_ref)
        sq_ref[...] = jnp.zeros_like(sq_ref)

    x = x_ref[...].astype(jnp.float32)
    # Row (outer-dim) reduction: pure VPU vreg adds, no cross-lane (XLU) work.
    s = jnp.sum(x, axis=0)          # (C, bm)
    s2 = jnp.sum(x * x, axis=0)     # (C, bm)
    # Fold lane columns down to the accumulator width using static 128-aligned lane slices
    # (vreg-column adds on the VPU). The final cross-lane reduce happens once, in the JAX fold.
    acc_w = sum_ref.shape[-1]
    ncols = s.shape[-1] // acc_w
    ps, ps2 = s[:, :acc_w], s2[:, :acc_w]
    for col in range(1, ncols):
        lo = col * acc_w
        ps = ps + s[:, lo:lo + acc_w]
        ps2 = ps2 + s2[:, lo:lo + acc_w]
    sum_ref[...] += ps[None]
    sq_ref[...] += ps2[None]


def _norm_kernel(x_ref, ss_ref, o_ref):
    # ss_ref: (2, bt, C, 1) packed [scale; shift]. out = x * scale + shift (one FMA / element).
    x = x_ref[...].astype(jnp.float32)
    o_ref[...] = (x * ss_ref[0] + ss_ref[1]).astype(o_ref.dtype)


def tebn2d_forward(x, weight, gamma, beta, eps=1e-5, block_rows=None, block_lanes=None):
    """x: (N, T, C, H, W); weight: (1, T, 1, 1, 1); gamma/beta: (C,)."""
    N, T, C, H, W = x.shape
    NT, HW = N * T, H * W
    itemsize = jnp.dtype(x.dtype).itemsize
    elems_target, vmem_limit = _chip_budget()

    x_r = x.reshape(NT, C, HW)                   # free reshape, no transpose / data movement
    bt, bm = _pick_tiles(NT, C, HW, elems_target, block_rows, block_lanes)
    grid = (NT // bt, HW // bm)
    acc_w = 128 if bm % 128 == 0 else bm         # lane width of the partial-sum accumulators

    # ---- pass 1: per-(row-block, channel, lane) partial sums / sums-of-squares ----
    psum, psq = pl.pallas_call(
        _stats_kernel,
        out_shape=(jax.ShapeDtypeStruct((grid[0], C, acc_w), jnp.float32),
                   jax.ShapeDtypeStruct((grid[0], C, acc_w), jnp.float32)),
        grid_spec=pl.GridSpec(
            grid=grid,
            in_specs=[pl.BlockSpec((bt, C, bm), lambda i, j: (i, 0, j))],
            out_specs=(pl.BlockSpec((1, C, acc_w), lambda i, j: (i, 0, 0)),
                       pl.BlockSpec((1, C, acc_w), lambda i, j: (i, 0, 0)))),
        compiler_params=pltpu.CompilerParams(
            dimension_semantics=("parallel", "arbitrary"),   # row axis megacore-shardable
            vmem_limit_bytes=vmem_limit),
        cost_estimate=pl.CostEstimate(
            flops=3 * x_r.size, transcendentals=0,
            bytes_accessed=x_r.size * itemsize + 2 * grid[0] * C * acc_w * 4),
    )(x_r)

    # ---- tiny fold (plain JAX, ~grid_rows*C*128 + T*C elements) ----
    count = jnp.float32(NT * HW)
    sum_x = jnp.sum(psum, axis=(0, 2))                         # (C,)
    sum_x2 = jnp.sum(psq, axis=(0, 2))                         # (C,)
    mean = sum_x / count
    var = jnp.maximum(sum_x2 / count - mean * mean, 0.0)       # biased var, clamped >= 0
    g = gamma.astype(jnp.float32) * jax.lax.rsqrt(var + jnp.float32(eps))
    b = beta.astype(jnp.float32) - mean * g
    w_t = weight.reshape(T).astype(jnp.float32)                # (T,)
    ss = jnp.stack([w_t[:, None] * g[None, :],                 # scale(t, c)
                    w_t[:, None] * b[None, :]])                # shift(t, c)   -> (2, T, C)
    ss = jnp.tile(ss, (1, N, 1)).reshape(2, NT, C, 1)          # row r -> t = r % T

    # ---- pass 2: fused normalize + temporal scaling (fully parallel grid) ----
    out = pl.pallas_call(
        _norm_kernel,
        out_shape=jax.ShapeDtypeStruct((NT, C, HW), x.dtype),
        grid_spec=pl.GridSpec(
            grid=grid,
            in_specs=[pl.BlockSpec((bt, C, bm), lambda i, j: (i, 0, j)),
                      pl.BlockSpec((2, bt, C, 1), lambda i, j: (0, i, 0, 0))],
            out_specs=pl.BlockSpec((bt, C, bm), lambda i, j: (i, 0, j))),
        compiler_params=pltpu.CompilerParams(
            dimension_semantics=("parallel", "parallel"),
            vmem_limit_bytes=vmem_limit),
        cost_estimate=pl.CostEstimate(
            flops=2 * x_r.size, transcendentals=0,
            bytes_accessed=2 * x_r.size * itemsize + ss.size * 4),
    )(x_r, ss)

    return out.reshape(N, T, C, H, W)


def _reference(x, weight, gamma, beta, eps=1e-5):
    # Pure-JAX reference: BN over (N, T, H, W) per channel, then per-timestep scaling.
    mean = jnp.mean(x, axis=(0, 1, 3, 4), keepdims=True)
    var = jnp.mean((x - mean) ** 2, axis=(0, 1, 3, 4), keepdims=True)
    normx = (x - mean) / jnp.sqrt(var + eps)
    normx = normx * gamma.reshape(1, 1, -1, 1, 1) + beta.reshape(1, 1, -1, 1, 1)
    return normx * weight


if __name__ == "__main__":
    N, T, C, H, W = 2, 8, 4, 16, 16
    key = jax.random.PRNGKey(0)
    x = jax.random.normal(key, (N, T, C, H, W), dtype=jnp.float32)

    # Deterministic parameters, matching TEBN2d.__init__ / bn_init:
    weight = jnp.ones((1, T, 1, 1, 1), dtype=jnp.float32)   # TEBN temporal weight (ones)
    gamma = jnp.ones((C,), dtype=jnp.float32)               # inner BatchNorm2d gamma
    beta = jnp.zeros((C,), dtype=jnp.float32)               # inner BatchNorm2d beta

    ref = _reference(x, weight, gamma, beta)

    # Auto-picked tiles (single block at this toy size).
    out = jax.block_until_ready(tebn2d_forward(x, weight, gamma, beta))
    assert out.shape == (N, T, C, H, W)
    assert jnp.allclose(out, ref, atol=1e-4, rtol=1e-4)

    # Correctness-only tiny tiles: multi-step grid exercising cross-block accumulation along
    # both grid axes (never use 128-lane blocks for production shapes).
    out_tiled = jax.block_until_ready(
        tebn2d_forward(x, weight, gamma, beta, block_rows=4, block_lanes=128))
    assert jnp.allclose(out_tiled, ref, atol=1e-4, rtol=1e-4)

    # Non-trivial learned parameters (post-training forward), tiling that exercises the
    # in-kernel lane-column fold (bm=256 -> two 128-lane columns).
    k1, k2, k3 = jax.random.split(jax.random.PRNGKey(1), 3)
    weight2 = jax.random.normal(k1, (1, T, 1, 1, 1), dtype=jnp.float32)
    gamma2 = jax.random.normal(k2, (C,), dtype=jnp.float32)
    beta2 = jax.random.normal(k3, (C,), dtype=jnp.float32)
    ref2 = _reference(x, weight2, gamma2, beta2)
    out2 = jax.block_until_ready(
        tebn2d_forward(x, weight2, gamma2, beta2, block_rows=8, block_lanes=256))
    assert jnp.allclose(out2, ref2, atol=1e-4, rtol=1e-4)

    # Non-128-multiple spatial size (14x14): exercises the documented full-lane fallback.
    x_odd = jax.random.normal(jax.random.PRNGKey(2), (N, T, C, 14, 14), dtype=jnp.float32)
    ref3 = _reference(x_odd, weight2, gamma2, beta2)
    out3 = jax.block_until_ready(tebn2d_forward(x_odd, weight2, gamma2, beta2))
    assert jnp.allclose(out3, ref3, atol=1e-4, rtol=1e-4)

    print("KERNEL_OK")
</pallas_src>

<mosaic_0001>
module attributes {stable_mosaic.version = 11 : i64} {
  func.func @_stats_kernel(%arg0: i32, %arg1: i32, %arg2: memref<16x4x256xf32, #tpu.memory_space<vmem>>, %arg3: memref<1x4x128xf32, #tpu.memory_space<vmem>>, %arg4: memref<1x4x128xf32, #tpu.memory_space<vmem>>) attributes {dimension_semantics = [#tpu.dimension_semantics<parallel>, #tpu.dimension_semantics<arbitrary>], iteration_bounds = array<i64: 1, 1>, scalar_prefetch = 0 : i64, scratch_operands = 0 : i64, tpu.core_type = #tpu.core_type<tc>, window_params = [{transform_indices = @transform_0, window_bounds = array<i64: 16, 4, 256>}, {transform_indices = @transform_1, window_bounds = array<i64: 1, 4, 128>}, {transform_indices = @transform_2, window_bounds = array<i64: 1, 4, 128>}]} {
    %c0_i32 = arith.constant 0 : i32
    %0 = arith.cmpi eq, %arg1, %c0_i32 : i32
    %1 = arith.extui %0 : i1 to i32
    %c0_i32_0 = arith.constant 0 : i32
    %2 = arith.cmpi ne, %1, %c0_i32_0 : i32
    scf.if %2 {
      %cst_16 = arith.constant 0.000000e+00 : f32
      %21 = vector.broadcast %cst_16 : f32 to vector<1x4x128xf32>
      %c0_17 = arith.constant 0 : index
      %c0_18 = arith.constant 0 : index
      %c0_19 = arith.constant 0 : index
      %22 = vector.load %arg3[%c0_17, %c0_18, %c0_19] : memref<1x4x128xf32, #tpu.memory_space<vmem>>, vector<1x4x128xf32>
      tpu.vector_store %arg3[%c0_17, %c0_18, %c0_19], %21 {strides = array<i32>} : memref<1x4x128xf32, #tpu.memory_space<vmem>>, vector<1x4x128xf32>,
      %cst_20 = arith.constant 0.000000e+00 : f32
      %23 = vector.broadcast %cst_20 : f32 to vector<1x4x128xf32>
      %c0_21 = arith.constant 0 : index
      %c0_22 = arith.constant 0 : index
      %c0_23 = arith.constant 0 : index
      %24 = vector.load %arg4[%c0_21, %c0_22, %c0_23] : memref<1x4x128xf32, #tpu.memory_space<vmem>>, vector<1x4x128xf32>
      tpu.vector_store %arg4[%c0_21, %c0_22, %c0_23], %23 {strides = array<i32>} : memref<1x4x128xf32, #tpu.memory_space<vmem>>, vector<1x4x128xf32>,
    } else {
    }
    %c0 = arith.constant 0 : index
    %c0_1 = arith.constant 0 : index
    %c0_2 = arith.constant 0 : index
    %3 = vector.load %arg2[%c0, %c0_1, %c0_2] : memref<16x4x256xf32, #tpu.memory_space<vmem>>, vector<16x4x256xf32>
    %cst = arith.constant dense<0.000000e+00> : vector<4x256xf32>
    %4 = vector.multi_reduction <add>, %3, %cst [0] : vector<16x4x256xf32> to vector<4x256xf32>
    %5 = arith.mulf %3, %3 : vector<16x4x256xf32>
    %cst_3 = arith.constant dense<0.000000e+00> : vector<4x256xf32>
    %6 = vector.multi_reduction <add>, %5, %cst_3 [0] : vector<16x4x256xf32> to vector<4x256xf32>
    %7 = vector.extract_strided_slice %4 {offsets = [0, 0], sizes = [4, 128], strides = [1, 1]} : vector<4x256xf32> to vector<4x128xf32>
    %8 = vector.extract_strided_slice %6 {offsets = [0, 0], sizes = [4, 128], strides = [1, 1]} : vector<4x256xf32> to vector<4x128xf32>
    %9 = vector.extract_strided_slice %4 {offsets = [0, 128], sizes = [4, 128], strides = [1, 1]} : vector<4x256xf32> to vector<4x128xf32>
    %10 = arith.addf %7, %9 : vector<4x128xf32>
    %11 = vector.extract_strided_slice %6 {offsets = [0, 128], sizes = [4, 128], strides = [1, 1]} : vector<4x256xf32> to vector<4x128xf32>
    %12 = arith.addf %8, %11 : vector<4x128xf32>
    %c0_4 = arith.constant 0 : index
    %c0_5 = arith.constant 0 : index
    %c0_6 = arith.constant 0 : index
    %13 = vector.load %arg3[%c0_4, %c0_5, %c0_6] : memref<1x4x128xf32, #tpu.memory_space<vmem>>, vector<1x4x128xf32>
    %14 = vector.shape_cast %10 : vector<4x128xf32> to vector<1x4x128xf32>
    %15 = arith.addf %13, %14 : vector<1x4x128xf32>
    %c0_7 = arith.constant 0 : index
    %c0_8 = arith.constant 0 : index
    %c0_9 = arith.constant 0 : index
    %16 = vector.load %arg3[%c0_7, %c0_8, %c0_9] : memref<1x4x128xf32, #tpu.memory_space<vmem>>, vector<1x4x128xf32>
    tpu.vector_store %arg3[%c0_7, %c0_8, %c0_9], %15 {strides = array<i32>} : memref<1x4x128xf32, #tpu.memory_space<vmem>>, vector<1x4x128xf32>,
    %c0_10 = arith.constant 0 : index
    %c0_11 = arith.constant 0 : index
    %c0_12 = arith.constant 0 : index
    %17 = vector.load %arg4[%c0_10, %c0_11, %c0_12] : memref<1x4x128xf32, #tpu.memory_space<vmem>>, vector<1x4x128xf32>
    %18 = vector.shape_cast %12 : vector<4x128xf32> to vector<1x4x128xf32>
    %19 = arith.addf %17, %18 : vector<1x4x128xf32>
    %c0_13 = arith.constant 0 : index
    %c0_14 = arith.constant 0 : index
    %c0_15 = arith.constant 0 : index
    %20 = vector.load %arg4[%c0_13, %c0_14, %c0_15] : memref<1x4x128xf32, #tpu.memory_space<vmem>>, vector<1x4x128xf32>
    tpu.vector_store %arg4[%c0_13, %c0_14, %c0_15], %19 {strides = array<i32>} : memref<1x4x128xf32, #tpu.memory_space<vmem>>, vector<1x4x128xf32>,
    return
  }
  func.func @transform_0(%arg0: i32, %arg1: i32) -> (i32, i32, i32) {
    %c0_i32 = arith.constant 0 : i32
    %c0_i32_0 = arith.constant 0 : i32
    return %arg0, %c0_i32, %arg1 : i32, i32, i32
  }
  func.func @transform_1(%arg0: i32, %arg1: i32) -> (i32, i32, i32) {
    %c0_i32 = arith.constant 0 : i32
    %c0_i32_0 = arith.constant 0 : i32
    %c0_i32_1 = arith.constant 0 : i32
    return %arg0, %c0_i32, %c0_i32_0 : i32, i32, i32
  }
  func.func @transform_2(%arg0: i32, %arg1: i32) -> (i32, i32, i32) {
    %c0_i32 = arith.constant 0 : i32
    %c0_i32_0 = arith.constant 0 : i32
    %c0_i32_1 = arith.constant 0 : i32
    return %arg0, %c0_i32, %c0_i32_0 : i32, i32, i32
  }
}

</mosaic_0001>

<bundles_post_ra>
// kernel: tpu_custom_call.1
= control target key start
LH: loop header
LB: loop body
LE: loop exit
PB: predicated region body
PF: predicated region fallthrough
CT: control target
= control target key end

     0   :  { %8 = vsyncpa [#allocation3], 0  ;;  %s690_s0 = inlined_call_operand.hbm [shape: f32[16,4,256], index: 0, kind: input, shape index: {}]   ;;  %s691_s1 = inlined_call_operand.hbm [shape: f32[1,4,128], index: 1, kind: output, shape index: {0}]   ;;  %s692_s2 = inlined_call_operand.hbm [shape: f32[1,4,128], index: 2, kind: output, shape index: {1}]  }
   0x1   :  { %9 = vsyncpa [#allocation4], 0 }
   0x2   :  { %10 = vsyncpa [#allocation7], 0  ;;  %s15_s11 = sshll.u32 %s690_s0, 4  ;;  %s514_s12 = smov [#allocation2]   ;;  %s16_s11 = int_to_ptr.hbm [resolvable:$true] %s15_s11 }
   0x3   :  { %s17_s13 = sshll.u32 %s514_s12, 4  ;;  %s515_s14 = smov 128   ;;  %s18_s13 = int_to_ptr.vmem [resolvable:$true] %s17_s13 }
   0x4   :  { %s516_s15 = smov 8  }
   0x5   :  { %23 = dma.hbm_to_vmem [thread:$0]  %s16_s11, 2048, %s18_s13, [#allocation3], %s515_s14, %s515_s14, %s516_s15  }
   0x6   :  { %508 = dma.done.wait [#allocation3], 2048  }
   0x7   :  { %509 = vsyncadd [#allocation3], 4294965248  ;;  %v538_v0 = vld [vmem:[#allocation2] sm:$0xff]  ;;  %v540_v1 = vld [vmem:[#allocation2 + $0x8] sm:$0xff]  ;;  %vm149_vm0 = vcmask 1043456   ;;  %v517_v6 = vmov 0.0  }
   0x8   :  { %v542_v2 = vld [vmem:[#allocation2 + $0x10] sm:$0xff]  ;;  %66 = vst [vmem:[#allocation1] ss:$2 sm:$0xff] %v538_v0  ;;  %v545_v3 = vld [vmem:[#allocation2 + $0x18] sm:$0xff]  ;;  %v550_v4 = vld [vmem:[#allocation2 + $0x20] sm:$0xff]  ;;  %s518_s0 = smov [#allocation5]  }
   0x9   :  { %70 = vst [vmem:[#allocation1 + $0x10] ss:$2 sm:$0xff] %v540_v1  ;;  %v552_v5 = vld [vmem:[#allocation2 + $0x28] sm:$0xff]  ;;  %v558_v11 = vld [vmem:[#allocation2 + $0x30] sm:$0xff]  ;;  %v563_v16 = vld [vmem:[#allocation2 + $0x38] sm:$0xff]  ;;  %s402_s16 = sshll.u32 %s518_s0, 4  ;;  %s403_s16 = int_to_ptr.vmem [resolvable:$true] %s402_s16 }
   0xa   :  { %74 = vst [vmem:[#allocation1 + $0x20] ss:$2 sm:$0xff] %v542_v2  ;;  %v567_v24 = vld [vmem:[#allocation2 + $0x40] sm:$0xff]  ;;  %v573_v30 = vld [vmem:[#allocation2 + $0x48] sm:$0xff]  ;;  %v578_v37 = vld [vmem:[#allocation2 + $0x50] sm:$0xff]  ;;  %s404_s19 = sshll.u32 %s691_s1, 4  ;;  %s405_s19 = int_to_ptr.hbm [resolvable:$true] %s404_s19 }
   0xb   :  { %78 = vst [vmem:[#allocation1 + $0x30] ss:$2 sm:$0xff] %v545_v3  ;;  %v583_v44 = vld [vmem:[#allocation2 + $0x58] sm:$0xff]  ;;  %v588_v51 = vld [vmem:[#allocation2 + $0x60] sm:$0xff]  ;;  %v593_v58 = vld [vmem:[#allocation2 + $0x68] sm:$0xff]  ;;  %s519_s1 = smov [#allocation6]  }
   0xc   :  { %32 = vst [vmem:[#allocation5] sm:$0xf] %v517_v6  ;;  %v596_v62 = vld [vmem:[#allocation2 + $0x70] sm:$0xff]  ;;  %s413_s20 = sshll.u32 %s519_s1, 4  ;;  %s415_s23 = sshll.u32 %s692_s2, 4  ;;  %s414_s20 = int_to_ptr.vmem [resolvable:$true] %s413_s20  ;;  %s416_s23 = int_to_ptr.hbm [resolvable:$true] %s415_s23 }
   0xd   :  { %33 = vst [vmem:[#allocation6] sm:$0xf] %v517_v6  ;;  %v215_v6 = vmul.f32 %v545_v3, %v545_v3 }
   0xf   :  { %v67_v7 = vld.sshfl [vmem:[#allocation1] sm:$0xff pattern:$0x75316420]  ;;  %v68_v8 = vld.sshfl [vmem:[#allocation1 + $0x8] sm:$0xff pattern:$0x75316420] }
  0x10   :  { %81 = vst [vmem:[#allocation1] ss:$2 sm:$0xff] %v550_v4  ;;  %v150_v9 = vsel %vm149_vm0, %v67_v7, 0.0  ;;  %v181_v10 = vsel %vm149_vm0, %v68_v8, 0.0 }
  0x11   :  { %v71_v12 = vld.sshfl [vmem:[#allocation1 + $0x10] sm:$0xff pattern:$0x75316420]  ;;  %v72_v13 = vld.sshfl [vmem:[#allocation1 + $0x18] sm:$0xff pattern:$0x75316420] }
  0x12   :  { %84 = vst [vmem:[#allocation1 + $0x10] ss:$2 sm:$0xff] %v552_v5  ;;  %v151_v14 = vsel %vm149_vm0, %v71_v12, 0.0  ;;  %v182_v15 = vsel %vm149_vm0, %v72_v13, 0.0  ;;  %v601_v13 = vld [vmem:[#allocation2 + $0x78] sm:$0xff] }
  0x13   :  { %v75_v17 = vld.sshfl [vmem:[#allocation1 + $0x20] sm:$0xff pattern:$0x75316420]  ;;  %v76_v18 = vld.sshfl [vmem:[#allocation1 + $0x28] sm:$0xff pattern:$0x75316420]  ;;  %v152_v19 = vadd.f32 %v151_v14, %v150_v9  ;;  %v183_v20 = vadd.f32 %v182_v15, %v181_v10 }
  0x14   :  { %87 = vst [vmem:[#allocation1 + $0x20] ss:$2 sm:$0xff] %v558_v11  ;;  %v79_v21 = vld.sshfl [vmem:[#allocation1 + $0x30] sm:$0xff pattern:$0x75316420]  ;;  %v153_v22 = vsel %vm149_vm0, %v75_v17, 0.0 }
  0x15   :  { %v80_v23 = vld.sshfl [vmem:[#allocation1 + $0x38] sm:$0xff pattern:$0x75316420]  ;;  %v154_v25 = vadd.f32 %v153_v22, %v152_v19  ;;  %v155_v26 = vsel %vm149_vm0, %v79_v21, 0.0  ;;  %v184_v27 = vsel %vm149_vm0, %v76_v18, 0.0  ;;  %v212_v21 = vmul.f32 %v538_v0, %v538_v0 }
  0x16   :  { %90 = vst [vmem:[#allocation1 + $0x30] ss:$2 sm:$0xff] %v563_v16  ;;  %v185_v28 = vadd.f32 %v184_v27, %v183_v20  ;;  %v186_v29 = vsel %vm149_vm0, %v80_v23, 0.0 }
  0x17   :  { %v82_v31 = vld.sshfl [vmem:[#allocation1] sm:$0xff pattern:$0x75316420]  ;;  %v83_v32 = vld.sshfl [vmem:[#allocation1 + $0x8] sm:$0xff pattern:$0x75316420]  ;;  %v156_v33 = vadd.f32 %v155_v26, %v154_v25 }
  0x18   :  { %93 = vst [vmem:[#allocation1] ss:$2 sm:$0xff] %v567_v24  ;;  %v157_v34 = vsel %vm149_vm0, %v82_v31, 0.0  ;;  %v187_v35 = vadd.f32 %v186_v29, %v185_v28  ;;  %v188_v36 = vsel %vm149_vm0, %v83_v32, 0.0  ;;  %v213_v29 = vmul.f32 %v540_v1, %v540_v1 }
  0x19   :  { %v158_v38 = vadd.f32 %v157_v34, %v156_v33  ;;  %v85_v39 = vld.sshfl [vmem:[#allocation1 + $0x10] sm:$0xff pattern:$0x75316420]  ;;  %v86_v40 = vld.sshfl [vmem:[#allocation1 + $0x18] sm:$0xff pattern:$0x75316420] }
  0x1a   :  { %v189_v41 = vadd.f32 %v188_v36, %v187_v35  ;;  %96 = vst [vmem:[#allocation1 + $0x10] ss:$2 sm:$0xff] %v573_v30  ;;  %v159_v42 = vsel %vm149_vm0, %v85_v39, 0.0  ;;  %v190_v43 = vsel %vm149_vm0, %v86_v40, 0.0  ;;  %v214_v36 = vmul.f32 %v542_v2, %v542_v2 }
  0x1b   :  { %v160_v45 = vadd.f32 %v159_v42, %v158_v38  ;;  %v88_v46 = vld.sshfl [vmem:[#allocation1 + $0x20] sm:$0xff pattern:$0x75316420]  ;;  %v89_v47 = vld.sshfl [vmem:[#allocation1 + $0x28] sm:$0xff pattern:$0x75316420] }
  0x1c   :  { %v191_v48 = vadd.f32 %v190_v43, %v189_v41  ;;  %99 = vst [vmem:[#allocation1 + $0x20] ss:$2 sm:$0xff] %v578_v37  ;;  %v161_v49 = vsel %vm149_vm0, %v88_v46, 0.0  ;;  %v192_v50 = vsel %vm149_vm0, %v89_v47, 0.0  ;;  %v216_v47 = vmul.f32 %v550_v4, %v550_v4 }
  0x1d   :  { %v162_v52 = vadd.f32 %v161_v49, %v160_v45  ;;  %v91_v53 = vld.sshfl [vmem:[#allocation1 + $0x30] sm:$0xff pattern:$0x75316420]  ;;  %v92_v54 = vld.sshfl [vmem:[#allocation1 + $0x38] sm:$0xff pattern:$0x75316420]  ;;  %v217_v49 = vmul.f32 %v552_v5, %v552_v5 }
  0x1e   :  { %v193_v55 = vadd.f32 %v192_v50, %v191_v48  ;;  %102 = vst [vmem:[#allocation1 + $0x30] ss:$2 sm:$0xff] %v583_v44  ;;  %v163_v56 = vsel %vm149_vm0, %v91_v53, 0.0  ;;  %v194_v57 = vsel %vm149_vm0, %v92_v54, 0.0 }
  0x1f   :  { %v94_v59 = vld.sshfl [vmem:[#allocation1] sm:$0xff pattern:$0x75316420]  ;;  %v95_v60 = vld.sshfl [vmem:[#allocation1 + $0x8] sm:$0xff pattern:$0x75316420]  ;;  %v164_v61 = vadd.f32 %v163_v56, %v162_v52  ;;  %v218_v56 = vmul.f32 %v558_v11, %v558_v11 }
  0x20   :  { %105 = vst [vmem:[#allocation1] ss:$2 sm:$0xff] %v588_v51  ;;  %v165_v63 = vsel %vm149_vm0, %v94_v59, 0.0  ;;  %v195_v7 = vadd.f32 %v194_v57, %v193_v55  ;;  %v196_v8 = vsel %vm149_vm0, %v95_v60, 0.0 }
  0x21   :  { %v97_v9 = vld.sshfl [vmem:[#allocation1 + $0x10] sm:$0xff pattern:$0x75316420]  ;;  %v98_v10 = vld.sshfl [vmem:[#allocation1 + $0x18] sm:$0xff pattern:$0x75316420]  ;;  %v166_v12 = vadd.f32 %v165_v63, %v164_v61 }
  0x22   :  { %108 = vst [vmem:[#allocation1 + $0x10] ss:$2 sm:$0xff] %v593_v58  ;;  %v167_v14 = vsel %vm149_vm0, %v97_v9, 0.0  ;;  %v197_v15 = vadd.f32 %v196_v8, %v195_v7  ;;  %v198_v17 = vsel %vm149_vm0, %v98_v10, 0.0 }
  0x23   :  { %v100_v18 = vld.sshfl [vmem:[#allocation1 + $0x20] sm:$0xff pattern:$0x75316420]  ;;  %v101_v19 = vld.sshfl [vmem:[#allocation1 + $0x28] sm:$0xff pattern:$0x75316420]  ;;  %v168_v20 = vadd.f32 %v167_v14, %v166_v12  ;;  %v220_v14 = vmul.f32 %v567_v24, %v567_v24  ;;  %v219_v24 = vmul.f32 %v563_v16, %v563_v16 }
  0x24   :  { %111 = vst [vmem:[#allocation1 + $0x20] ss:$2 sm:$0xff] %v596_v62  ;;  %v169_v22 = vsel %vm149_vm0, %v100_v18, 0.0  ;;  %v199_v23 = vadd.f32 %v198_v17, %v197_v15  ;;  %v200_v25 = vsel %vm149_vm0, %v101_v19, 0.0  ;;  %v221_v17 = vmul.f32 %v573_v30, %v573_v30 }
  0x25   :  { %v103_v26 = vld.sshfl [vmem:[#allocation1 + $0x30] sm:$0xff pattern:$0x75316420]  ;;  %v104_v27 = vld.sshfl [vmem:[#allocation1 + $0x38] sm:$0xff pattern:$0x75316420]  ;;  %v170_v28 = vadd.f32 %v169_v22, %v168_v20  ;;  %v222_v30 = vmul.f32 %v578_v37, %v578_v37 }
  0x26   :  { %114 = vst [vmem:[#allocation1 + $0x30] ss:$2 sm:$0xff] %v601_v13  ;;  %v171_v31 = vsel %vm149_vm0, %v103_v26, 0.0  ;;  %v201_v32 = vadd.f32 %v200_v25, %v199_v23  ;;  %v202_v0 = vsel %vm149_vm0, %v104_v27, 0.0 }
  0x27   :  { %v106_v33 = vld.sshfl [vmem:[#allocation1] sm:$0xff pattern:$0x75316420]  ;;  %v107_v34 = vld.sshfl [vmem:[#allocation1 + $0x8] sm:$0xff pattern:$0x75316420]  ;;  %v172_v35 = vadd.f32 %v171_v31, %v170_v28 }
  0x28   :  { %244 = vst [vmem:[#allocation1] ss:$2 sm:$0xff] %v212_v21  ;;  %v173_v38 = vsel %vm149_vm0, %v106_v33, 0.0  ;;  %v203_v39 = vadd.f32 %v202_v0, %v201_v32  ;;  %v204_v40 = vsel %vm149_vm0, %v107_v34, 0.0 }
  0x29   :  { %v109_v1 = vld.sshfl [vmem:[#allocation1 + $0x10] sm:$0xff pattern:$0x75316420]  ;;  %v110_v41 = vld.sshfl [vmem:[#allocation1 + $0x18] sm:$0xff pattern:$0x75316420]  ;;  %v174_v45 = vadd.f32 %v173_v38, %v172_v35  ;;  %v224_v35 = vmul.f32 %v588_v51, %v588_v51 }
  0x2a   :  { %248 = vst [vmem:[#allocation1 + $0x10] ss:$2 sm:$0xff] %v213_v29  ;;  %v205_v46 = vadd.f32 %v204_v40, %v203_v39  ;;  %v175_v48 = vsel %vm149_vm0, %v109_v1, 0.0  ;;  %v206_v2 = vsel %vm149_vm0, %v110_v41, 0.0  ;;  %v391_v29 = vld [vmem:[#allocation5] sm:$0xf] }
  0x2b   :  { %v112_v42 = vld.sshfl [vmem:[#allocation1 + $0x20] sm:$0xff pattern:$0x75316420]  ;;  %v113_v43 = vld.sshfl [vmem:[#allocation1 + $0x28] sm:$0xff pattern:$0x75316420]  ;;  %v176_v54 = vadd.f32 %v175_v48, %v174_v45 }
  0x2c   :  { %252 = vst [vmem:[#allocation1 + $0x20] ss:$2 sm:$0xff] %v214_v36  ;;  %v177_v50 = vsel %vm149_vm0, %v112_v42, 0.0  ;;  %v207_v55 = vadd.f32 %v206_v2, %v205_v46  ;;  %v208_v59 = vsel %vm149_vm0, %v113_v43, 0.0  ;;  %v225_v36 = vmul.f32 %v593_v58, %v593_v58 }
  0x2d   :  { %v115_v4 = vld.sshfl [vmem:[#allocation1 + $0x30] sm:$0xff pattern:$0x75316420]  ;;  %v116_v57 = vld.sshfl [vmem:[#allocation1 + $0x38] sm:$0xff pattern:$0x75316420]  ;;  %v178_v10 = vadd.f32 %v177_v50, %v176_v54  ;;  %v223_v50 = vmul.f32 %v583_v44, %v583_v44 }
  0x2e   :  { %v209_v12 = vadd.f32 %v208_v59, %v207_v55  ;;  %v179_v3 = vsel %vm149_vm0, %v115_v4, 0.0  ;;  %v210_v15 = vsel %vm149_vm0, %v116_v57, 0.0  ;;  %256 = vst [vmem:[#allocation1 + $0x30] ss:$2 sm:$0xff] %v215_v6 }
  0x2f   :  { %v245_v52 = vld.sshfl [vmem:[#allocation1] sm:$0xff pattern:$0x75316420]  ;;  %v246_v53 = vld.sshfl [vmem:[#allocation1 + $0x8] sm:$0xff pattern:$0x75316420]  ;;  %v180_v25 = vadd.f32 %v179_v3, %v178_v10 }
  0x30   :  { %259 = vst [vmem:[#allocation1] ss:$2 sm:$0xff] %v216_v47  ;;  %v327_v5 = vsel %vm149_vm0, %v245_v52, 0.0  ;;  %v358_v63 = vsel %vm149_vm0, %v246_v53, 0.0  ;;  %v211_v26 = vadd.f32 %v210_v15, %v209_v12  ;;  %v227_v12 = vmul.f32 %v601_v13, %v601_v13 }
  0x31   :  { %v249_v60 = vld.sshfl [vmem:[#allocation1 + $0x10] sm:$0xff pattern:$0x75316420]  ;;  %v250_v61 = vld.sshfl [vmem:[#allocation1 + $0x18] sm:$0xff pattern:$0x75316420] }
  0x32   :  { %v328_v7 = vsel %vm149_vm0, %v249_v60, 0.0  ;;  %v359_v8 = vsel %vm149_vm0, %v250_v61, 0.0  ;;  %262 = vst [vmem:[#allocation1 + $0x10] ss:$2 sm:$0xff] %v217_v49  ;;  %v389_v34 = vadd.f32 %v211_v26, %v180_v25 }
  0x33   :  { %v253_v11 = vld.sshfl [vmem:[#allocation1 + $0x20] sm:$0xff pattern:$0x75316420]  ;;  %v254_v9 = vld.sshfl [vmem:[#allocation1 + $0x28] sm:$0xff pattern:$0x75316420]  ;;  %v329_v18 = vadd.f32 %v328_v7, %v327_v5  ;;  %v360_v20 = vadd.f32 %v359_v8, %v358_v63 }
  0x34   :  { %265 = vst [vmem:[#allocation1 + $0x20] ss:$2 sm:$0xff] %v218_v56  ;;  %v330_v19 = vsel %vm149_vm0, %v253_v11, 0.0  ;;  %v361_v21 = vsel %vm149_vm0, %v254_v9, 0.0  ;;  %v392_v46 = vadd.f32 %v391_v29, %v389_v34  ;;  %v226_v56 = vmul.f32 %v596_v62, %v596_v62 }
  0x35   :  { %v331_v31 = vadd.f32 %v330_v19, %v329_v18  ;;  %v362_v32 = vadd.f32 %v361_v21, %v360_v20  ;;  %v257_v38 = vld.sshfl [vmem:[#allocation1 + $0x30] sm:$0xff pattern:$0x75316420]  ;;  %v258_v16 = vld.sshfl [vmem:[#allocation1 + $0x38] sm:$0xff pattern:$0x75316420] }
  0x36   :  { %268 = vst [vmem:[#allocation1 + $0x30] ss:$2 sm:$0xff] %v219_v24  ;;  %v332_v39 = vsel %vm149_vm0, %v257_v38, 0.0  ;;  %v363_v40 = vsel %vm149_vm0, %v258_v16, 0.0 }
  0x37   :  { %v260_v22 = vld.sshfl [vmem:[#allocation1] sm:$0xff pattern:$0x75316420]  ;;  %v261_v23 = vld.sshfl [vmem:[#allocation1 + $0x8] sm:$0xff pattern:$0x75316420]  ;;  %v333_v41 = vadd.f32 %v332_v39, %v331_v31  ;;  %v364_v43 = vadd.f32 %v363_v40, %v362_v32 }
  0x38   :  { %271 = vst [vmem:[#allocation1] ss:$2 sm:$0xff] %v220_v14  ;;  %v334_v37 = vsel %vm149_vm0, %v260_v22, 0.0  ;;  %v365_v1 = vsel %vm149_vm0, %v261_v23, 0.0 }
  0x39   :  { %v263_v27 = vld.sshfl [vmem:[#allocation1 + $0x10] sm:$0xff pattern:$0x75316420]  ;;  %v264_v28 = vld.sshfl [vmem:[#allocation1 + $0x18] sm:$0xff pattern:$0x75316420]  ;;  %v335_v47 = vadd.f32 %v334_v37, %v333_v41  ;;  %v366_v2 = vadd.f32 %v365_v1, %v364_v43 }
  0x3a   :  { %274 = vst [vmem:[#allocation1 + $0x10] ss:$2 sm:$0xff] %v221_v17  ;;  %v336_v42 = vsel %vm149_vm0, %v263_v27, 0.0  ;;  %v367_v51 = vsel %vm149_vm0, %v264_v28, 0.0 }
  0x3b   :  { %v266_v0 = vld.sshfl [vmem:[#allocation1 + $0x20] sm:$0xff pattern:$0x75316420]  ;;  %v267_v33 = vld.sshfl [vmem:[#allocation1 + $0x28] sm:$0xff pattern:$0x75316420]  ;;  %v337_v54 = vadd.f32 %v336_v42, %v335_v47  ;;  %v368_v55 = vadd.f32 %v367_v51, %v366_v2 }
  0x3c   :  { %277 = vst [vmem:[#allocation1 + $0x20] ss:$2 sm:$0xff] %v222_v30  ;;  %v338_v48 = vsel %vm149_vm0, %v266_v0, 0.0  ;;  %v369_v49 = vsel %vm149_vm0, %v267_v33, 0.0 }
  0x3d   :  { %393 = vst [vmem:[#allocation5] sm:$0xf] %v392_v46  ;;  %v269_v57 = vld.sshfl [vmem:[#allocation1 + $0x30] sm:$0xff pattern:$0x75316420]  ;;  %v339_v44 = vadd.f32 %v338_v48, %v337_v54  ;;  %v370_v6 = vadd.f32 %v369_v49, %v368_v55 }
  0x3e   :  { %v270_v59 = vld.sshfl [vmem:[#allocation1 + $0x38] sm:$0xff pattern:$0x75316420]  ;;  %v340_v61 = vsel %vm149_vm0, %v269_v57, 0.0  ;;  %407 = dma.vmem_to_hbm [thread:$0]  %s403_s16, 64, %s405_s19, [#allocation4]  }
  0x3f   :  { %v272_v45 = vld.sshfl [vmem:[#allocation1] sm:$0xff pattern:$0x75316420]  ;;  %v273_v58 = vld.sshfl [vmem:[#allocation1 + $0x8] sm:$0xff pattern:$0x75316420]  ;;  %v341_v63 = vadd.f32 %v340_v61, %v339_v44 }
  0x40   :  { %283 = vst [vmem:[#allocation1] ss:$2 sm:$0xff] %v224_v35  ;;  %v342_v4 = vsel %vm149_vm0, %v272_v45, 0.0  ;;  %v371_v7 = vsel %vm149_vm0, %v270_v59, 0.0  ;;  %v373_v8 = vsel %vm149_vm0, %v273_v58, 0.0 }
  0x41   :  { %v275_v52 = vld.sshfl [vmem:[#allocation1 + $0x10] sm:$0xff pattern:$0x75316420]  ;;  %v276_v53 = vld.sshfl [vmem:[#allocation1 + $0x18] sm:$0xff pattern:$0x75316420]  ;;  %v372_v11 = vadd.f32 %v371_v7, %v370_v6  ;;  %v343_v9 = vadd.f32 %v342_v4, %v341_v63 }
  0x42   :  { %286 = vst [vmem:[#allocation1 + $0x10] ss:$2 sm:$0xff] %v225_v36  ;;  %v344_v62 = vsel %vm149_vm0, %v275_v52, 0.0  ;;  %v375_v10 = vsel %vm149_vm0, %v276_v53, 0.0  ;;  %v394_v46 = vld [vmem:[#allocation6] sm:$0xf] }
  0x43   :  { %280 = vst [vmem:[#allocation1 + $0x30] ss:$2 sm:$0xff] %v223_v50  ;;  %v278_v60 = vld.sshfl [vmem:[#allocation1 + $0x20] sm:$0xff pattern:$0x75316420]  ;;  %v374_v15 = vadd.f32 %v373_v8, %v372_v11  ;;  %v345_v18 = vadd.f32 %v344_v62, %v343_v9 }
  0x44   :  { %v279_v5 = vld.sshfl [vmem:[#allocation1 + $0x28] sm:$0xff pattern:$0x75316420]  ;;  %v346_v3 = vsel %vm149_vm0, %v278_v60, 0.0 }
  0x45   :  { %289 = vst [vmem:[#allocation1 + $0x20] ss:$2 sm:$0xff] %v226_v56  ;;  %v377_v19 = vsel %vm149_vm0, %v279_v5, 0.0  ;;  %v376_v22 = vadd.f32 %v375_v10, %v374_v15  ;;  %v347_v26 = vadd.f32 %v346_v3, %v345_v18 }
  0x47   :  { %v284_v14 = vld.sshfl [vmem:[#allocation1] sm:$0xff pattern:$0x75316420]  ;;  %v285_v17 = vld.sshfl [vmem:[#allocation1 + $0x8] sm:$0xff pattern:$0x75316420]  ;;  %v378_v13 = vadd.f32 %v377_v19, %v376_v22 }
  0x48   :  { %v350_v27 = vsel %vm149_vm0, %v284_v14, 0.0  ;;  %v381_v31 = vsel %vm149_vm0, %v285_v17, 0.0 }
  0x49   :  { %v287_v20 = vld.sshfl [vmem:[#allocation1 + $0x10] sm:$0xff pattern:$0x75316420]  ;;  %v288_v21 = vld.sshfl [vmem:[#allocation1 + $0x18] sm:$0xff pattern:$0x75316420] }
  0x4a   :  { %v281_v23 = vld.sshfl [vmem:[#allocation1 + $0x30] sm:$0xff pattern:$0x75316420]  ;;  %v282_v25 = vld.sshfl [vmem:[#allocation1 + $0x38] sm:$0xff pattern:$0x75316420] }
  0x4b   :  { %292 = vst [vmem:[#allocation1 + $0x30] ss:$2 sm:$0xff] %v227_v12  ;;  %v348_v24 = vsel %vm149_vm0, %v281_v23, 0.0  ;;  %v379_v28 = vsel %vm149_vm0, %v282_v25, 0.0  ;;  %v352_v0 = vsel %vm149_vm0, %v287_v20, 0.0  ;;  %v383_v35 = vsel %vm149_vm0, %v288_v21, 0.0 }
  0x4c   :  { %v290_v30 = vld.sshfl [vmem:[#allocation1 + $0x20] sm:$0xff pattern:$0x75316420]  ;;  %v349_v29 = vadd.f32 %v348_v24, %v347_v26  ;;  %v291_v32 = vld.sshfl [vmem:[#allocation1 + $0x28] sm:$0xff pattern:$0x75316420]  ;;  %v380_v33 = vadd.f32 %v379_v28, %v378_v13 }
  0x4d   :  { %v354_v36 = vsel %vm149_vm0, %v290_v30, 0.0  ;;  %v385_v39 = vsel %vm149_vm0, %v291_v32, 0.0 }
  0x4e   :  { %v351_v34 = vadd.f32 %v350_v27, %v349_v29  ;;  %v382_v38 = vadd.f32 %v381_v31, %v380_v33 }
  0x50   :  { %v353_v16 = vadd.f32 %v352_v0, %v351_v34  ;;  %v384_v37 = vadd.f32 %v383_v35, %v382_v38 }
  0x52   :  { %v293_v40 = vld.sshfl [vmem:[#allocation1 + $0x30] sm:$0xff pattern:$0x75316420]  ;;  %v294_v1 = vld.sshfl [vmem:[#allocation1 + $0x38] sm:$0xff pattern:$0x75316420]  ;;  %v355_v41 = vadd.f32 %v354_v36, %v353_v16  ;;  %v386_v43 = vadd.f32 %v385_v39, %v384_v37 }
  0x53   :  { %v356_v42 = vsel %vm149_vm0, %v293_v40, 0.0  ;;  %v387_v51 = vsel %vm149_vm0, %v294_v1, 0.0 }
  0x54   :  { %v357_v45 = vadd.f32 %v356_v42, %v355_v41  ;;  %v388_v58 = vadd.f32 %v387_v51, %v386_v43 }
  0x56   :  { %v390_v47 = vadd.f32 %v388_v58, %v357_v45 }
  0x58   :  { %v395_v48 = vadd.f32 %v394_v46, %v390_v47 }
  0x5a   :  { %396 = vst [vmem:[#allocation6] sm:$0xf] %v395_v48 }
  0x5b   :  { %418 = dma.vmem_to_hbm [thread:$0]  %s414_s20, 64, %s416_s23, [#allocation7]  }
  0x5c   :  { %510 = dma.done.wait [#allocation4], 64  }
  0x5d   :  { %511 = vsyncadd [#allocation4], 4294967232 }
  0x5e   :  { %512 = dma.done.wait [#allocation7], 64  }
  0x5f   :  { %513 = vsyncadd [#allocation7], 4294967232 }
  0x60   :  { %427 = vsyncpa [#allocation3], 1 }
  0x61   :  { %428 = vsyncpa [#allocation4], 1 }
  0x62   :  { %429 = vsyncpa [#allocation7], 1 }

</bundles_post_ra>
